<compile_context>
chip_gen: v7x
topology: tpu7x:2x2x1
jax: 0.10.0
libtpu: 0.0.40
codegen_flags: <defaults>
</compile_context>

<pallas_src>
import functools

import jax
import jax.numpy as jnp
from jax.experimental import pallas as pl
from jax.experimental.pallas import tpu as pltpu


def _round_up(x, m):
    return ((x + m - 1) // m) * m


def _label_smooth_ce_kernel(logits_ref, targets_ref, weight_ref, out_ref, *,
                            label_pos, label_neg, denom, n_rows, block_rows,
                            num_classes):
    i = pl.program_id(0)

    # --- zero the resident scalar accumulator on the first tile ---
    @pl.when(i == 0)
    def _():
        out_ref[...] = jnp.zeros_like(out_ref)

    x = logits_ref[...].astype(jnp.float32)                    # (TN, C)
    tgt = targets_ref[...]                                      # (TN, 1) int32
    w = weight_ref[...]                                         # (TN, 1) f32

    # log-partition per row: logZ = m + log(sum(exp(x - m)))
    m = jnp.max(x, axis=-1, keepdims=True)                      # (TN, 1)
    lse = jnp.log(jnp.sum(jnp.exp(x - m), axis=-1, keepdims=True))
    logz = m + lse                                              # (TN, 1)

    # x[target] via one masked reduce, sum_c(x) via one plain reduce
    col = jax.lax.broadcasted_iota(jnp.int32, x.shape, 1)
    x_tgt = jnp.sum(jnp.where(col == tgt, x, 0.0), axis=-1, keepdims=True)
    x_sum = jnp.sum(x, axis=-1, keepdims=True)

    # loss_row = -sum_c lb_c * log_softmax_c
    #          = -(lp - ln) * (x_tgt - logZ) - ln * (sum_c x - C * logZ)
    per_row = -(jnp.float32(label_pos - label_neg) * (x_tgt - logz)
                + jnp.float32(label_neg) * (x_sum - jnp.float32(num_classes) * logz))
    per_row = per_row * w                                       # element-wise weight

    # mask rows beyond the true N (tail tile padding may be garbage / NaN)
    row = i * block_rows + jax.lax.broadcasted_iota(jnp.int32, per_row.shape, 0)
    per_row = jnp.where(row < n_rows, per_row, 0.0)

    out_ref[...] += jnp.sum(per_row, axis=0, keepdims=True)     # (1, 1)

    # --- finalize: mean with avg_factor = B*P (weight_reduce_loss) ---
    @pl.when(i == pl.num_programs(0) - 1)
    def _():
        out_ref[...] = out_ref[...] / jnp.float32(denom)


def label_smooth_cross_entropy_loss(logits, targets, weight, neg_factor=0.1,
                                    block_rows=None):
    """logits: (B, P, C) float (any float dtype), targets: (B, P) int,
    weight: (B*P,) float. Returns scalar mean loss (f32)."""
    B, P, C = logits.shape
    N = B * P

    logits2d = logits.reshape(N, C)                     # keep native dtype
    targets2d = targets.reshape(N, 1).astype(jnp.int32)
    weight2d = weight.reshape(N, 1).astype(jnp.float32)

    # Sublane granularity: 16 for sub-32-bit dtypes (bf16/fp16), else 8.
    itemsize = jnp.dtype(logits2d.dtype).itemsize
    sub = 16 if itemsize < 4 else 8

    # Pick TN so one logits block stays <= ~4 MiB (double-buffered ~8 MiB),
    # which fits comfortably under the smallest scoped-VMEM default (v5e 16 MiB,
    # v7x 32 MiB scoped / 64 MiB physical).
    if block_rows is None:
        budget_bytes = 4 * 1024 * 1024
        tn = max(sub, budget_bytes // max(1, C * itemsize))
        tn = (tn // sub) * sub
        tn = min(tn, 1024)
    else:
        tn = block_rows
    tn = min(tn, _round_up(N, sub))
    tn = max(tn, sub)

    n_tiles = pl.cdiv(N, tn)

    label_pos = 1.0 - neg_factor
    label_neg = neg_factor / C
    eps = float(jnp.finfo(jnp.float32).eps)

    kernel = functools.partial(
        _label_smooth_ce_kernel,
        label_pos=float(label_pos),
        label_neg=float(label_neg),
        denom=float(B * P) + eps,
        n_rows=N,
        block_rows=tn,
        num_classes=C,
    )

    out = pl.pallas_call(
        kernel,
        out_shape=jax.ShapeDtypeStruct((1, 1), jnp.float32),
        grid=(n_tiles,),
        in_specs=[
            pl.BlockSpec((tn, C), lambda i: (i, 0)),   # logits tile
            pl.BlockSpec((tn, 1), lambda i: (i, 0)),   # targets tile
            pl.BlockSpec((tn, 1), lambda i: (i, 0)),   # weight tile
        ],
        out_specs=pl.BlockSpec((1, 1), lambda i: (0, 0)),  # resident accumulator
        compiler_params=pltpu.CompilerParams(
            dimension_semantics=("arbitrary",),
            vmem_limit_bytes=32 * 1024 * 1024,
        ),
    )(logits2d, targets2d, weight2d)
    return out[0, 0]


def _reference(logits, targets, weight, neg_factor=0.1):
    # pure-JAX reference mirroring the PyTorch module
    B, P, C = logits.shape
    x = logits.reshape(-1, C).astype(jnp.float32)
    t = targets.reshape(-1)
    logs = jax.nn.log_softmax(x, axis=1)
    label_pos, label_neg = 1.0 - neg_factor, neg_factor / C
    onehot = jax.nn.one_hot(t, C, dtype=jnp.float32)
    lb = onehot * label_pos + (1.0 - onehot) * label_neg
    loss = -jnp.sum(logs * lb, axis=1) * weight.reshape(-1).astype(jnp.float32)
    return jnp.sum(loss) / (B * P + jnp.finfo(jnp.float32).eps)


if __name__ == "__main__":
    B, P, C = 2, 8, 32
    key = jax.random.PRNGKey(0)
    k1, k2, k3 = jax.random.split(key, 3)
    logits = jax.random.normal(k1, (B, P, C), dtype=jnp.float32)
    targets = jax.random.randint(k2, (B, P), 0, C, dtype=jnp.int32)
    weight = jax.random.uniform(k3, (B * P,), dtype=jnp.float32)

    # f32 logits
    loss = label_smooth_cross_entropy_loss(logits, targets, weight, neg_factor=0.1)
    loss = jax.block_until_ready(loss)
    ref = _reference(logits, targets, weight, neg_factor=0.1)
    assert jnp.allclose(loss, ref, rtol=1e-5, atol=1e-6), (loss, ref)

    # bf16 logits passed through in native dtype (half the HBM bytes)
    logits_bf16 = logits.astype(jnp.bfloat16)
    loss_bf16 = label_smooth_cross_entropy_loss(logits_bf16, targets, weight,
                                                neg_factor=0.1)
    loss_bf16 = jax.block_until_ready(loss_bf16)
    ref_bf16 = _reference(logits_bf16, targets, weight, neg_factor=0.1)
    assert jnp.allclose(loss_bf16, ref_bf16, rtol=1e-4, atol=1e-5), (loss_bf16, ref_bf16)

    print("KERNEL_OK")
</pallas_src>

<mosaic_0001>
module attributes {stable_mosaic.version = 11 : i64} {
  func.func @_label_smooth_ce_kernel(%arg0: i32, %arg1: memref<16x32xf32, #tpu.memory_space<vmem>>, %arg2: memref<16x1xi32, #tpu.memory_space<vmem>>, %arg3: memref<16x1xf32, #tpu.memory_space<vmem>>, %arg4: memref<1x1xf32, #tpu.memory_space<vmem>>) attributes {dimension_semantics = [#tpu.dimension_semantics<arbitrary>], iteration_bounds = array<i64: 1>, scalar_prefetch = 0 : i64, scratch_operands = 0 : i64, tpu.core_type = #tpu.core_type<tc>, window_params = [{transform_indices = @transform_0, window_bounds = array<i64: 16, 32>}, {transform_indices = @transform_1, window_bounds = array<i64: 16, 1>}, {transform_indices = @transform_2, window_bounds = array<i64: 16, 1>}, {pipeline_mode = #tpu.pipeline_mode<synchronous>, transform_indices = @transform_3, window_bounds = array<i64: 1, 1>}]} {
    %c0_i32 = arith.constant 0 : i32
    %0 = arith.cmpi eq, %arg0, %c0_i32 : i32
    %1 = arith.extui %0 : i1 to i32
    %c0_i32_0 = arith.constant 0 : i32
    %2 = arith.cmpi ne, %1, %c0_i32_0 : i32
    scf.if %2 {
      %cst_23 = arith.constant 0.000000e+00 : f32
      %52 = vector.broadcast %cst_23 : f32 to vector<1x1xf32>
      %c0_24 = arith.constant 0 : index
      %c0_25 = arith.constant 0 : index
      %53 = vector.load %arg4[%c0_24, %c0_25] : memref<1x1xf32, #tpu.memory_space<vmem>>, vector<1x1xf32>
      tpu.vector_store %arg4[%c0_24, %c0_25], %52 {strides = array<i32>} : memref<1x1xf32, #tpu.memory_space<vmem>>, vector<1x1xf32>,
    } else {
    }
    %c0 = arith.constant 0 : index
    %c0_1 = arith.constant 0 : index
    %3 = vector.load %arg1[%c0, %c0_1] : memref<16x32xf32, #tpu.memory_space<vmem>>, vector<16x32xf32>
    %c0_2 = arith.constant 0 : index
    %c0_3 = arith.constant 0 : index
    %4 = vector.load %arg2[%c0_2, %c0_3] : memref<16x1xi32, #tpu.memory_space<vmem>>, vector<16x1xi32>
    %c0_4 = arith.constant 0 : index
    %c0_5 = arith.constant 0 : index
    %5 = vector.load %arg3[%c0_4, %c0_5] : memref<16x1xf32, #tpu.memory_space<vmem>>, vector<16x1xf32>
    %cst = arith.constant dense<0xFF800000> : vector<16xf32>
    %6 = vector.multi_reduction <maximumf>, %3, %cst [1] : vector<16x32xf32> to vector<16xf32>
    %7 = vector.shape_cast %6 : vector<16xf32> to vector<16x1xf32>
    %8 = vector.broadcast %7 : vector<16x1xf32> to vector<16x32xf32>
    %9 = arith.subf %3, %8 : vector<16x32xf32>
    %10 = math.exp %9 : vector<16x32xf32>
    %cst_6 = arith.constant dense<0.000000e+00> : vector<16xf32>
    %11 = vector.multi_reduction <add>, %10, %cst_6 [1] : vector<16x32xf32> to vector<16xf32>
    %12 = vector.shape_cast %11 : vector<16xf32> to vector<16x1xf32>
    %13 = math.log %12 : vector<16x1xf32>
    %14 = arith.addf %7, %13 : vector<16x1xf32>
    %15 = tpu.iota {dimensions = array<i32: 1>} : vector<16x32xi32>
    %16 = vector.broadcast %4 : vector<16x1xi32> to vector<16x32xi32>
    %17 = arith.cmpi eq, %15, %16 : vector<16x32xi32>
    %cst_7 = arith.constant 0.000000e+00 : f32
    %18 = vector.broadcast %cst_7 : f32 to vector<16x32xf32>
    %19 = arith.select %17, %3, %18 : vector<16x32xi1>, vector<16x32xf32>
    %cst_8 = arith.constant dense<0.000000e+00> : vector<16xf32>
    %20 = vector.multi_reduction <add>, %19, %cst_8 [1] : vector<16x32xf32> to vector<16xf32>
    %21 = vector.shape_cast %20 : vector<16xf32> to vector<16x1xf32>
    %cst_9 = arith.constant dense<0.000000e+00> : vector<16xf32>
    %22 = vector.multi_reduction <add>, %3, %cst_9 [1] : vector<16x32xf32> to vector<16xf32>
    %23 = vector.shape_cast %22 : vector<16xf32> to vector<16x1xf32>
    %24 = arith.subf %21, %14 : vector<16x1xf32>
    %cst_10 = arith.constant 8.968750e-01 : f32
    %25 = vector.broadcast %cst_10 : f32 to vector<16x1xf32>
    %26 = arith.mulf %25, %24 : vector<16x1xf32>
    %cst_11 = arith.constant 3.200000e+01 : f32
    %27 = vector.broadcast %cst_11 : f32 to vector<16x1xf32>
    %28 = arith.mulf %27, %14 : vector<16x1xf32>
    %29 = arith.subf %23, %28 : vector<16x1xf32>
    %cst_12 = arith.constant 3.125000e-03 : f32
    %30 = vector.broadcast %cst_12 : f32 to vector<16x1xf32>
    %31 = arith.mulf %30, %29 : vector<16x1xf32>
    %32 = arith.addf %26, %31 : vector<16x1xf32>
    %cst_13 = arith.constant 0.000000e+00 : f32
    %33 = vector.broadcast %cst_13 : f32 to vector<16x1xf32>
    %34 = arith.subf %33, %32 : vector<16x1xf32>
    %35 = arith.mulf %34, %5 : vector<16x1xf32>
    %c16_i32 = arith.constant 16 : i32
    %36 = arith.muli %arg0, %c16_i32 : i32
    %37 = tpu.iota {dimensions = array<i32: 0>} : vector<16x1xi32>
    %38 = vector.broadcast %36 : i32 to vector<16x1xi32>
    %39 = arith.addi %38, %37 : vector<16x1xi32>
    %c16_i32_14 = arith.constant 16 : i32
    %40 = vector.broadcast %c16_i32_14 : i32 to vector<16x1xi32>
    %41 = arith.cmpi slt, %39, %40 : vector<16x1xi32>
    %cst_15 = arith.constant 0.000000e+00 : f32
    %42 = vector.broadcast %cst_15 : f32 to vector<16x1xf32>
    %43 = arith.select %41, %35, %42 : vector<16x1xi1>, vector<16x1xf32>
    %c0_16 = arith.constant 0 : index
    %c0_17 = arith.constant 0 : index
    %44 = vector.load %arg4[%c0_16, %c0_17] : memref<1x1xf32, #tpu.memory_space<vmem>>, vector<1x1xf32>
    %cst_18 = arith.constant dense<0.000000e+00> : vector<1xf32>
    %45 = vector.multi_reduction <add>, %43, %cst_18 [0] : vector<16x1xf32> to vector<1xf32>
    %46 = vector.shape_cast %45 : vector<1xf32> to vector<1x1xf32>
    %47 = arith.addf %44, %46 : vector<1x1xf32>
    %c0_19 = arith.constant 0 : index
    %c0_20 = arith.constant 0 : index
    %48 = vector.load %arg4[%c0_19, %c0_20] : memref<1x1xf32, #tpu.memory_space<vmem>>, vector<1x1xf32>
    tpu.vector_store %arg4[%c0_19, %c0_20], %47 {strides = array<i32>} : memref<1x1xf32, #tpu.memory_space<vmem>>, vector<1x1xf32>,
    %c0_i32_21 = arith.constant 0 : i32
    %49 = arith.cmpi eq, %arg0, %c0_i32_21 : i32
    %50 = arith.extui %49 : i1 to i32
    %c0_i32_22 = arith.constant 0 : i32
    %51 = arith.cmpi ne, %50, %c0_i32_22 : i32
    scf.if %51 {
      %c0_23 = arith.constant 0 : index
      %c0_24 = arith.constant 0 : index
      %52 = vector.load %arg4[%c0_23, %c0_24] : memref<1x1xf32, #tpu.memory_space<vmem>>, vector<1x1xf32>
      %cst_25 = arith.constant 1.600000e+01 : f32
      %53 = vector.broadcast %cst_25 : f32 to vector<1x1xf32>
      %54 = arith.divf %52, %53 : vector<1x1xf32>
      %c0_26 = arith.constant 0 : index
      %c0_27 = arith.constant 0 : index
      %55 = vector.load %arg4[%c0_26, %c0_27] : memref<1x1xf32, #tpu.memory_space<vmem>>, vector<1x1xf32>
      tpu.vector_store %arg4[%c0_26, %c0_27], %54 {strides = array<i32>} : memref<1x1xf32, #tpu.memory_space<vmem>>, vector<1x1xf32>,
    } else {
    }
    return
  }
  func.func @transform_0(%arg0: i32) -> (i32, i32) {
    %c0_i32 = arith.constant 0 : i32
    %c0_i32_0 = arith.constant 0 : i32
    return %arg0, %c0_i32 : i32, i32
  }
  func.func @transform_1(%arg0: i32) -> (i32, i32) {
    %c0_i32 = arith.constant 0 : i32
    %c0_i32_0 = arith.constant 0 : i32
    return %arg0, %c0_i32 : i32, i32
  }
  func.func @transform_2(%arg0: i32) -> (i32, i32) {
    %c0_i32 = arith.constant 0 : i32
    %c0_i32_0 = arith.constant 0 : i32
    return %arg0, %c0_i32 : i32, i32
  }
  func.func @transform_3(%arg0: i32) -> (i32, i32) {
    %c0_i32 = arith.constant 0 : i32
    %c0_i32_0 = arith.constant 0 : i32
    %c0_i32_1 = arith.constant 0 : i32
    return %c0_i32, %c0_i32_0 : i32, i32
  }
}

</mosaic_0001>

<bundles_post_ra>
// kernel: tpu_custom_call.1
= control target key start
LH: loop header
LB: loop body
LE: loop exit
PB: predicated region body
PF: predicated region fallthrough
CT: control target
= control target key end

     0   :  { %vm27_vm0 = vcmask 261120   ;;  %v175_v4 = vmov 0   ;;  %s239_s0 = inlined_call_operand.vmem [shape: f32[16,32], index: 0, kind: input, shape index: {}]   ;;  %s240_s1 = inlined_call_operand.vmem [shape: s32[16,1], index: 1, kind: input, shape index: {}]   ;;  %s241_s2 = inlined_call_operand.vmem [shape: f32[16,1], index: 2, kind: input, shape index: {}]   ;;  %s242_s3 = inlined_call_operand.hbm [shape: f32[1,1], index: 3, kind: output, shape index: {}]  }
   0x1   :  { %v21_v0 = vld [vmem:[%s239_s0] sm:$0xff]  ;;  %v22_v1 = vld [vmem:[%s239_s0 + $0x8] sm:$0xff]  ;;  %141 = vset.pattern.permute.xlu1 %v175_v4  ;;  %142 = vset.pattern.permute.xlu0 %v175_v4 }
   0x2   :  { %v23_v2 = vld [vmem:[%s240_s1] sm:$0xff]  ;;  %v28_v3 = vsel %vm27_vm0, %v21_v0, -inf }
   0x3   :  { %8 = vsyncpa [#allocation3], 0  ;;  %29 = vmax.xlane.f32.xlu0 %v28_v3  ;;  %55 = vperm.xlu1 %141, %v23_v2   ;;  %v31_v5 = vsel %vm27_vm0, %v22_v1, -inf  ;;  %v24_v6 = vld [vmem:[%s240_s1 + $0x8] sm:$0xff]  ;;  %v52_v11 = vlaneseq  ;;  %v70_v25 = vsel %vm27_vm0, %v21_v0, 0.0  ;;  %v73_v26 = vsel %vm27_vm0, %v22_v1, 0.0 }
   0x4   :  { %vm19_vm3 = vcmask 0   ;;  %v176_v27 = vmov 0.0   ;;  %v25_v52 = vld [vmem:[%s241_s2] sm:$0xff]  ;;  %v26_v54 = vld [vmem:[%s241_s2 + $0x8] sm:$0xff]  ;;  %vm104_vm4 = vcmask 7168   ;;  %s177_s22 = smov [#allocation2]  }
   0x5   :  { %v53_v15 = vand.u32 127, %v52_v11  ;;  %20 = vst.msk [vmem:[#allocation2] sm:$0x1] %vm19_vm3, %v176_v27  ;;  %s130_s23 = sshll.u32 %s177_s22, 4  ;;  %s131_s23 = int_to_ptr.vmem [resolvable:$true] %s130_s23 }
   0x6   :  { %s151_s2 = scalar_lea.vmem %s131_s23, 16  ;;  %s155_s24 = scalar_lea.vmem %s131_s23, 32 }
   0x7   :  { %32 = vmax.xlane.f32.xlu0 %v31_v5  ;;  %58 = vperm.xlu1 %141, %v24_v6   ;;  %p152_p0 = scmp.ne.s32.totalorder %s131_s23, %s151_s2  ;;  %p156_p1 = scmp.lt.s32.totalorder %s131_s23, %s131_s23 }
   0x8   :  { %p157_p2 = scmp.lt.s32.totalorder %s155_s24, %s151_s2 }
   0xa   :  { %p158_p3 = por %p157_p2, %p156_p1 }
   0xc   :  { %v103_v2 = vld [vmem:[#allocation2] sm:$0x1]  ;;  %p159_p4 = pnand %p158_p3, %p152_p0 }
  0x82   :  { %v56_v14 = vpop.permute.xlu1 %55 }
  0x83   :  { %vm60_vm1 = vcmp.eq.s32.totalorder %v53_v15, %v56_v14 }
  0x84   :  { %v62_v18 = vsel %vm60_vm1, %v21_v0, 0.0 }
  0x85   :  { %v64_v20 = vsel %vm27_vm0, %v62_v18, 0.0 }
  0x86   :  { %v59_v16 = vpop.permute.xlu1 %58 }
  0x87   :  { %vm61_vm2 = vcmp.eq.s32.totalorder %v53_v15, %v59_v16 }
  0x88   :  { %v63_v22 = vsel %vm61_vm2, %v22_v1, 0.0 }
  0x89   :  { %v67_v24 = vsel %vm27_vm0, %v63_v22, 0.0 }
  0x90   :  { %v30_v7 = vpop.xlane.xlu0 %29 }
  0x91   :  { %v34_v8 = vsub.f32 %v21_v0, %v30_v7 }
  0x93   :  { %v36_v9 = vmul.f32 1.442695, %v34_v8 }
  0x94   :  { %v33_v10 = vpop.xlane.xlu0 %32 }
  0x95   :  { %143 = vpow2.f32 %v36_v9  ;;  %v35_v12 = vsub.f32 %v22_v1, %v33_v10 }
  0x97   :  { %v38_v13 = vmul.f32 1.442695, %v35_v12 }
  0x99   :  { %145 = vpow2.f32 %v38_v13 }
  0x9f   :  { %v144_v17 = vpop.eup %143 }
  0xa0   :  { %v40_v19 = vsel %vm27_vm0, %v144_v17, 0.0 }
  0xa1   :  { %41 = vadd.xlane.f32.xlu0 %v40_v19 }
  0xa3   :  { %v146_v21 = vpop.eup %145 }
  0xa4   :  { %v43_v23 = vsel %vm27_vm0, %v146_v21, 0.0 }
  0xa5   :  { %44 = vadd.xlane.f32.xlu1 %v43_v23  ;;  %65 = vadd.xlane.f32.xlu0 %v64_v20 }
  0xa9   :  { %68 = vadd.xlane.f32.xlu0 %v67_v24 }
  0xad   :  { %71 = vadd.xlane.f32.xlu0 %v70_v25 }
  0xb1   :  { %74 = vadd.xlane.f32.xlu0 %v73_v26 }
 0x12e   :  { %v42_v28 = vpop.xlane.xlu0 %41 }
 0x12f   :  { %147 = vlog2.f32 %v42_v28 }
 0x132   :  { %v45_v29 = vpop.xlane.xlu1 %44  ;;  %v66_v30 = vpop.xlane.xlu0 %65 }
 0x133   :  { %149 = vlog2.f32 %v45_v29 }
 0x136   :  { %v69_v31 = vpop.xlane.xlu0 %68 }
 0x139   :  { %v148_v32 = vpop.eup %147 }
 0x13a   :  { %v47_v33 = vmul.f32 0.6931472, %v148_v32  ;;  %v72_v34 = vpop.xlane.xlu0 %71 }
 0x13c   :  { %v50_v35 = vadd.f32 %v47_v33, %v30_v7 }
 0x13d   :  { %v150_v36 = vpop.eup %149 }
 0x13e   :  { %v49_v37 = vmul.f32 0.6931472, %v150_v36  ;;  %v76_v38 = vsub.f32 %v66_v30, %v50_v35  ;;  %v80_v39 = vmul.f32 32.0, %v50_v35  ;;  %v75_v42 = vpop.xlane.xlu0 %74 }
 0x140   :  { %v51_v40 = vadd.f32 %v49_v37, %v33_v10  ;;  %v82_v41 = vsub.f32 %v72_v34, %v80_v39  ;;  %v78_v43 = vmul.f32 0.896875, %v76_v38 }
 0x142   :  { %v77_v44 = vsub.f32 %v69_v31, %v51_v40  ;;  %v84_v45 = vmul.f32 0.003125, %v82_v41  ;;  %v81_v46 = vmul.f32 32.0, %v51_v40 }
 0x144   :  { %v86_v47 = vadd.f32 %v84_v45, %v78_v43  ;;  %v83_v48 = vsub.f32 %v75_v42, %v81_v46  ;;  %v79_v49 = vmul.f32 0.896875, %v77_v44 }
 0x146   :  { %v88_v50 = vsub.f32 0.0, %v86_v47  ;;  %v85_v51 = vmul.f32 0.003125, %v83_v48 }
 0x148   :  { %v87_v53 = vadd.f32 %v85_v51, %v79_v49  ;;  %v90_v55 = vmul.f32 %v88_v50, %v25_v52 }
 0x14a   :  { %v89_v56 = vsub.f32 0.0, %v87_v53  ;;  %v105_v58 = vsel %vm104_vm4, %v90_v55, 0.0 }
 0x14c   :  { %v91_v57 = vmul.f32 %v89_v56, %v26_v54 }
 0x14e   :  { %v106_v59 = vsel %vm104_vm4, %v91_v57, 0.0 }
 0x14f   :  { %v107_v60 = vadd.f32 %v106_v59, %v105_v58 }
 0x151   :  { %v108_v61 = vrot.slane %v107_v60, 4 }
 0x153   :  { %v109_v62 = vadd.f32 %v108_v61, %v107_v60 }
 0x155   :  { %v110_v63 = vrot.slane %v109_v62, 2 }
 0x157   :  { %v111_v0 = vadd.f32 %v110_v63, %v109_v62 }
 0x159   :  { %v112_v1 = vrot.slane %v111_v0, 1 }
 0x15b   :  { %v113_v3 = vadd.f32 %v112_v1, %v111_v0 }
 0x15d   :  { %v114_v4 = vadd.f32 %v113_v3, %v103_v2 }
 0x15f   :  { %116 = vst.msk [vmem:[#allocation2] sm:$0x1] %vm19_vm3, %v114_v4 }
 0x166   :  { %v120_v5 = vld [vmem:[#allocation2] sm:$0x1] }
 0x167   :  { %v122_v6 = vmul.f32 0.0625, %v120_v5 }
 0x169   :  { %123 = vst.msk [vmem:[#allocation2] sm:$0x1] %vm19_vm3, %v122_v6 }
 0x16a   :  { %162 = shalt.err (!%p159_p4)
}
 0x16b   :  { %s163_s27 = scalar_lea.hbm %s242_s3, 16 }
 0x16c   :  { %p164_p5 = scmp.ne.s32.totalorder %s242_s3, %s163_s27  ;;  %p167_p6 = scmp.lt.u32.totalorder %s163_s27, %s242_s3 }
 0x16e   :  { %p169_p7 = pnand %p167_p6, %p164_p5 }
 0x170   :  { %172 = shalt.err (!%p169_p7)
}
 0x171   :  { %133 = dma.vmem_to_hbm [thread:$0]  %s131_s23, 16, %s242_s3, [#allocation3]  }
 0x172   :  { %173 = dma.done.wait [#allocation3], 16  }
 0x173   :  { %174 = vsyncadd [#allocation3], 4294967280 }
 0x174   :  { %137 = vsyncpa [#allocation3], 1 }

</bundles_post_ra>
